<compile_context>
chip_gen: v7x
topology: tpu7x:2x2x1
jax: 0.10.0
libtpu: 0.0.40
codegen_flags: <defaults>
</compile_context>

<pallas_src>
import math

import numpy as np
import jax
import jax.numpy as jnp
from jax.experimental import pallas as pl
from jax.experimental.pallas import tpu as pltpu


# ----------------------------------------------------------------------------
# Diffusion schedule buffers (float64 on host, cast to float32, matching the
# PyTorch module's register_buffer calls).
# ----------------------------------------------------------------------------
def cosine_beta_schedule(timesteps, s=0.008):
    steps = timesteps + 1
    x = np.linspace(0, timesteps, steps, dtype=np.float64)
    alphas_cumprod = np.cos((x / timesteps + s) / (1 + s) * math.pi * 0.5) ** 2
    alphas_cumprod = alphas_cumprod / alphas_cumprod[0]
    betas = 1.0 - alphas_cumprod[1:] / alphas_cumprod[:-1]
    return np.clip(betas, 0.0, 0.999)


def make_buffers(timesteps=1000, objective="pred_noise"):
    betas = cosine_beta_schedule(timesteps)
    alphas = 1.0 - betas
    alphas_cumprod = np.cumprod(alphas)
    sqrt_alphas_cumprod = np.sqrt(alphas_cumprod)
    sqrt_one_minus_alphas_cumprod = np.sqrt(1.0 - alphas_cumprod)
    snr = alphas_cumprod / (1.0 - alphas_cumprod)
    if objective == "pred_noise":
        loss_weight = np.ones_like(snr)
    elif objective == "pred_x0":
        loss_weight = snr
    elif objective == "pred_v":
        loss_weight = snr / (snr + 1.0)
    else:
        raise ValueError(objective)
    return (
        jnp.asarray(sqrt_alphas_cumprod, jnp.float32),
        jnp.asarray(sqrt_one_minus_alphas_cumprod, jnp.float32),
        jnp.asarray(loss_weight, jnp.float32),
    )


# ----------------------------------------------------------------------------
# Pallas kernel: q_sample -> stand-in denoiser -> fused weighted SSE partials.
# All refs are 2-D, lane-dense; no in-kernel reshapes of the data tiles.
# ----------------------------------------------------------------------------
def _p_losses_kernel(x_ref, noise_ref, sac_ref, som_ref, lw_ref,
                     w_ref, b_ref, out_ref):
    x = x_ref[...]                      # (TILE_M, NPAD) f32
    noise = noise_ref[...]              # (TILE_M, NPAD) f32

    # q_sample: per-row schedule coefficients broadcast over lanes (VPU, f32).
    x_t = sac_ref[...] * x + som_ref[...] * noise

    # Stand-in denoiser: bf16 MXU matmul (f32 accumulate) + bias + tanh (EUP).
    h = jnp.dot(x_t.astype(jnp.bfloat16), w_ref[...],
                preferred_element_type=jnp.float32)
    model_out = jnp.tanh(h + b_ref[...])

    # objective == 'pred_noise': target = noise.
    diff = model_out - noise
    sq = diff * diff                    # (TILE_M, NPAD) f32

    # Fused weighted reduction: one VPU multiply + one sublane reduce.
    partial = jnp.sum(lw_ref[...] * sq, axis=0, keepdims=True)   # (1, NPAD)

    out_ref[...] = partial.reshape(1, 1, partial.shape[-1])


def p_losses_pallas(x_start, t, sac_tab, som_tab, lw_tab, w_bf16, b, noise,
                    *, tile_m=None):
    """Weighted MSE diffusion loss (objective='pred_noise')."""
    B, C, N = x_start.shape
    M = B * C
    NPAD = ((N + 127) // 128) * 128

    if tile_m is None:
        # Fat M tiles for MXU occupancy; for v7x prefer a tile_m that yields an
        # even grid >= 2 so both TensorCores get work.
        tile_m = min(256, ((M + 7) // 8) * 8)
    tile_m = max(8, (tile_m // 8) * 8)
    M_PAD = ((M + tile_m - 1) // tile_m) * tile_m
    nbt = M_PAD // tile_m

    pad_m = M_PAD - M
    pad_n = NPAD - N

    # Flatten (B, C, N) -> (B*C, N); zero-pad rows/lanes (zero contribution).
    x2 = jnp.pad(x_start.reshape(M, N), ((0, pad_m), (0, pad_n)))
    n2 = jnp.pad(noise.reshape(M, N), ((0, pad_m), (0, pad_n)))

    # Pre-gather per-row schedule coefficients (extract()) in the wrapper.
    t_row = jnp.repeat(t.astype(jnp.int32), C)                   # (M,)
    sac_row = jnp.pad(sac_tab[t_row], (0, pad_m)).reshape(M_PAD, 1)
    som_row = jnp.pad(som_tab[t_row], (0, pad_m)).reshape(M_PAD, 1)
    lw_row = jnp.pad(lw_tab[t_row], (0, pad_m)).reshape(M_PAD, 1)

    # Stand-in model params, zero-padded to the lane-dense layout.
    wp = jnp.pad(w_bf16, ((0, pad_n), (0, pad_n)))
    bp = jnp.pad(b.astype(jnp.float32).reshape(1, N), ((0, 0), (0, pad_n)))

    row_map = lambda i: (i, 0)
    const_map = lambda i: (0, 0)

    grid_spec = pltpu.PrefetchScalarGridSpec(
        num_scalar_prefetch=0,
        grid=(nbt,),
        in_specs=[
            pl.BlockSpec((tile_m, NPAD), row_map),   # x
            pl.BlockSpec((tile_m, NPAD), row_map),   # noise
            pl.BlockSpec((tile_m, 1), row_map),      # sqrt_alphas_cumprod[t]
            pl.BlockSpec((tile_m, 1), row_map),      # sqrt_one_minus_alphas_cumprod[t]
            pl.BlockSpec((tile_m, 1), row_map),      # loss_weight[t]
            pl.BlockSpec((NPAD, NPAD), const_map),   # W (constant)
            pl.BlockSpec((1, NPAD), const_map),      # bias (constant)
        ],
        out_specs=pl.BlockSpec((1, 1, NPAD), lambda i: (i, 0, 0)),
    )

    out = pl.pallas_call(
        _p_losses_kernel,
        out_shape=jax.ShapeDtypeStruct((nbt, 1, NPAD), jnp.float32),
        grid_spec=grid_spec,
        compiler_params=pltpu.CompilerParams(
            dimension_semantics=("parallel",),
            vmem_limit_bytes=48 * 1024 * 1024,       # fits v7x 64 MiB/TC budget
        ),
    )(x2, n2, sac_row, som_row, lw_row, wp, bp)

    # Padded rows (lw=0) and padded lanes contribute exactly zero.
    return jnp.sum(out) / float(B * C * N)


# ----------------------------------------------------------------------------
# Pure-JAX reference (same math, same bf16 matmul operands).
# ----------------------------------------------------------------------------
def p_losses_ref(x_start, t, sac_tab, som_tab, lw_tab, w_bf16, b, noise):
    B, C, N = x_start.shape
    sac = sac_tab[t].reshape(B, 1, 1)
    som = som_tab[t].reshape(B, 1, 1)
    lw = lw_tab[t]
    x_t = sac * x_start + som * noise
    h = jnp.einsum("bcn,nm->bcm", x_t.astype(jnp.bfloat16), w_bf16,
                   preferred_element_type=jnp.float32)
    model_out = jnp.tanh(h + b.astype(jnp.float32).reshape(1, 1, N))
    sq = (model_out - noise) ** 2
    per_batch = jnp.mean(sq, axis=(1, 2)) * lw
    return jnp.mean(per_batch)


# ----------------------------------------------------------------------------
# GaussianDiffusion1D.forward: sample t, sample noise, compute p_losses.
# ----------------------------------------------------------------------------
def gaussian_diffusion_forward(x_start, key, buffers, model_params, timesteps,
                               *, tile_m=None):
    sac_tab, som_tab, lw_tab = buffers
    w_bf16, b = model_params
    B = x_start.shape[0]

    k_t, k_n = jax.random.split(key)
    t = jax.random.randint(k_t, (B,), 0, timesteps)          # torch.randint
    noise = jax.random.normal(k_n, x_start.shape, jnp.float32)  # torch.randn_like

    loss = p_losses_pallas(x_start, t, sac_tab, som_tab, lw_tab,
                           w_bf16, b, noise, tile_m=tile_m)
    return loss, t, noise


if __name__ == "__main__":
    timesteps = 1000
    C, N = 4, 16

    key = jax.random.PRNGKey(0)
    kx, kw, kb, k1, kx2, k2 = jax.random.split(key, 6)

    # Deterministic stand-in model parameters (position-mixing linear, bf16).
    w_bf16 = (0.05 * jax.random.normal(kw, (N, N), jnp.float32)).astype(jnp.bfloat16)
    b = 0.01 * jax.random.normal(kb, (N,), dtype=jnp.float32)
    buffers = make_buffers(timesteps=timesteps, objective="pred_noise")
    sac_tab, som_tab, lw_tab = buffers

    # 1) Module-sized check: B=2, C=4, N=16; single batch tile.
    B = 2
    x_start = jax.random.normal(kx, (B, C, N), dtype=jnp.float32)
    loss, t, noise = gaussian_diffusion_forward(
        x_start, k1, buffers, (w_bf16, b), timesteps)
    loss = jax.block_until_ready(loss)
    ref = jax.block_until_ready(
        p_losses_ref(x_start, t, sac_tab, som_tab, lw_tab, w_bf16, b, noise))
    assert jnp.isfinite(loss), "loss is not finite"
    assert jnp.allclose(loss, ref, rtol=1e-4, atol=1e-5), (loss, ref)

    # 2) Multi-tile check: bigger batch so the parallel grid has >= 2 steps
    #    (B*C = 64 rows, tile_m = 32 -> grid = (2,)).
    B2 = 16
    x_start2 = jax.random.normal(kx2, (B2, C, N), dtype=jnp.float32)
    loss2, t2, noise2 = gaussian_diffusion_forward(
        x_start2, k2, buffers, (w_bf16, b), timesteps, tile_m=32)
    loss2 = jax.block_until_ready(loss2)
    ref2 = jax.block_until_ready(
        p_losses_ref(x_start2, t2, sac_tab, som_tab, lw_tab, w_bf16, b, noise2))
    assert jnp.isfinite(loss2), "multi-tile loss is not finite"
    assert jnp.allclose(loss2, ref2, rtol=1e-4, atol=1e-5), (loss2, ref2)

    print("KERNEL_OK")
</pallas_src>

<mosaic_0001>
module attributes {stable_mosaic.version = 11 : i64} {
  func.func @_p_losses_kernel(%arg0: i32, %arg1: memref<8x128xf32, #tpu.memory_space<vmem>>, %arg2: memref<8x128xf32, #tpu.memory_space<vmem>>, %arg3: memref<8x1xf32, #tpu.memory_space<vmem>>, %arg4: memref<8x1xf32, #tpu.memory_space<vmem>>, %arg5: memref<8x1xf32, #tpu.memory_space<vmem>>, %arg6: memref<128x128xbf16, #tpu.memory_space<vmem>>, %arg7: memref<1x128xf32, #tpu.memory_space<vmem>>, %arg8: memref<1x1x128xf32, #tpu.memory_space<vmem>>) attributes {dimension_semantics = [#tpu.dimension_semantics<parallel>], iteration_bounds = array<i64: 1>, scalar_prefetch = 0 : i64, scratch_operands = 0 : i64, tpu.core_type = #tpu.core_type<tc>, window_params = [{transform_indices = @transform_0, window_bounds = array<i64: 8, 128>}, {transform_indices = @transform_1, window_bounds = array<i64: 8, 128>}, {transform_indices = @transform_2, window_bounds = array<i64: 8, 1>}, {transform_indices = @transform_3, window_bounds = array<i64: 8, 1>}, {transform_indices = @transform_4, window_bounds = array<i64: 8, 1>}, {pipeline_mode = #tpu.pipeline_mode<synchronous>, transform_indices = @transform_5, window_bounds = array<i64: 128, 128>}, {pipeline_mode = #tpu.pipeline_mode<synchronous>, transform_indices = @transform_6, window_bounds = array<i64: 1, 128>}, {transform_indices = @transform_7, window_bounds = array<i64: 1, 1, 128>}]} {
    %c0 = arith.constant 0 : index
    %c0_0 = arith.constant 0 : index
    %0 = vector.load %arg1[%c0, %c0_0] : memref<8x128xf32, #tpu.memory_space<vmem>>, vector<8x128xf32>
    %c0_1 = arith.constant 0 : index
    %c0_2 = arith.constant 0 : index
    %1 = vector.load %arg2[%c0_1, %c0_2] : memref<8x128xf32, #tpu.memory_space<vmem>>, vector<8x128xf32>
    %c0_3 = arith.constant 0 : index
    %c0_4 = arith.constant 0 : index
    %2 = vector.load %arg3[%c0_3, %c0_4] : memref<8x1xf32, #tpu.memory_space<vmem>>, vector<8x1xf32>
    %3 = vector.broadcast %2 : vector<8x1xf32> to vector<8x128xf32>
    %4 = arith.mulf %3, %0 : vector<8x128xf32>
    %c0_5 = arith.constant 0 : index
    %c0_6 = arith.constant 0 : index
    %5 = vector.load %arg4[%c0_5, %c0_6] : memref<8x1xf32, #tpu.memory_space<vmem>>, vector<8x1xf32>
    %6 = vector.broadcast %5 : vector<8x1xf32> to vector<8x128xf32>
    %7 = arith.mulf %6, %1 : vector<8x128xf32>
    %8 = arith.addf %4, %7 : vector<8x128xf32>
    %9 = arith.truncf %8 : vector<8x128xf32> to vector<8x128xbf16>
    %c0_7 = arith.constant 0 : index
    %c0_8 = arith.constant 0 : index
    %10 = vector.load %arg6[%c0_7, %c0_8] : memref<128x128xbf16, #tpu.memory_space<vmem>>, vector<128x128xbf16>
    %cst = arith.constant dense<0.000000e+00> : vector<8x128xf32>
    %11 = tpu.matmul %9, %10, %cst {dimension_numbers = #tpu.dot_dimension_numbers<[1], [0], [0], [1], [0, 0, 1, 1], [], []>} : vector<8x128xbf16>, vector<128x128xbf16>, vector<8x128xf32> -> vector<8x128xf32>
    %c0_9 = arith.constant 0 : index
    %c0_10 = arith.constant 0 : index
    %12 = vector.load %arg7[%c0_9, %c0_10] : memref<1x128xf32, #tpu.memory_space<vmem>>, vector<1x128xf32>
    %13 = vector.broadcast %12 : vector<1x128xf32> to vector<8x128xf32>
    %14 = arith.addf %11, %13 : vector<8x128xf32>
    %15 = math.tanh %14 : vector<8x128xf32>
    %16 = arith.subf %15, %1 : vector<8x128xf32>
    %17 = arith.mulf %16, %16 : vector<8x128xf32>
    %c0_11 = arith.constant 0 : index
    %c0_12 = arith.constant 0 : index
    %18 = vector.load %arg5[%c0_11, %c0_12] : memref<8x1xf32, #tpu.memory_space<vmem>>, vector<8x1xf32>
    %19 = vector.broadcast %18 : vector<8x1xf32> to vector<8x128xf32>
    %20 = arith.mulf %19, %17 : vector<8x128xf32>
    %cst_13 = arith.constant dense<0.000000e+00> : vector<128xf32>
    %21 = vector.multi_reduction <add>, %20, %cst_13 [0] : vector<8x128xf32> to vector<128xf32>
    %22 = vector.shape_cast %21 : vector<128xf32> to vector<1x128xf32>
    %23 = vector.shape_cast %22 : vector<1x128xf32> to vector<1x1x128xf32>
    %c0_14 = arith.constant 0 : index
    %c0_15 = arith.constant 0 : index
    %c0_16 = arith.constant 0 : index
    %24 = vector.load %arg8[%c0_14, %c0_15, %c0_16] : memref<1x1x128xf32, #tpu.memory_space<vmem>>, vector<1x1x128xf32>
    tpu.vector_store %arg8[%c0_14, %c0_15, %c0_16], %23 {strides = array<i32>} : memref<1x1x128xf32, #tpu.memory_space<vmem>>, vector<1x1x128xf32>,
    return
  }
  func.func @transform_0(%arg0: i32) -> (i32, i32) {
    %c0_i32 = arith.constant 0 : i32
    %c0_i32_0 = arith.constant 0 : i32
    return %arg0, %c0_i32 : i32, i32
  }
  func.func @transform_1(%arg0: i32) -> (i32, i32) {
    %c0_i32 = arith.constant 0 : i32
    %c0_i32_0 = arith.constant 0 : i32
    return %arg0, %c0_i32 : i32, i32
  }
  func.func @transform_2(%arg0: i32) -> (i32, i32) {
    %c0_i32 = arith.constant 0 : i32
    %c0_i32_0 = arith.constant 0 : i32
    return %arg0, %c0_i32 : i32, i32
  }
  func.func @transform_3(%arg0: i32) -> (i32, i32) {
    %c0_i32 = arith.constant 0 : i32
    %c0_i32_0 = arith.constant 0 : i32
    return %arg0, %c0_i32 : i32, i32
  }
  func.func @transform_4(%arg0: i32) -> (i32, i32) {
    %c0_i32 = arith.constant 0 : i32
    %c0_i32_0 = arith.constant 0 : i32
    return %arg0, %c0_i32 : i32, i32
  }
  func.func @transform_5(%arg0: i32) -> (i32, i32) {
    %c0_i32 = arith.constant 0 : i32
    %c0_i32_0 = arith.constant 0 : i32
    %c0_i32_1 = arith.constant 0 : i32
    return %c0_i32, %c0_i32_0 : i32, i32
  }
  func.func @transform_6(%arg0: i32) -> (i32, i32) {
    %c0_i32 = arith.constant 0 : i32
    %c0_i32_0 = arith.constant 0 : i32
    %c0_i32_1 = arith.constant 0 : i32
    return %c0_i32, %c0_i32_0 : i32, i32
  }
  func.func @transform_7(%arg0: i32) -> (i32, i32, i32) {
    %c0_i32 = arith.constant 0 : i32
    %c0_i32_0 = arith.constant 0 : i32
    %c0_i32_1 = arith.constant 0 : i32
    return %arg0, %c0_i32, %c0_i32_0 : i32, i32, i32
  }
}

</mosaic_0001>

<bundles_post_ra>
// kernel: tpu_custom_call.1
= control target key start
LH: loop header
LB: loop body
LE: loop exit
PB: predicated region body
PF: predicated region fallthrough
CT: control target
= control target key end

     0   :  { %12 = vsyncpa [#allocation3], 0  ;;  %s397_s0 = inlined_call_operand.vmem [shape: f32[8,128], index: 0, kind: input, shape index: {}]   ;;  %s398_s1 = inlined_call_operand.vmem [shape: f32[8,128], index: 1, kind: input, shape index: {}]   ;;  %s399_s2 = inlined_call_operand.vmem [shape: f32[8,1], index: 2, kind: input, shape index: {}]   ;;  %s400_s3 = inlined_call_operand.vmem [shape: f32[8,1], index: 3, kind: input, shape index: {}]   ;;  %s401_s4 = inlined_call_operand.vmem [shape: f32[8,1], index: 4, kind: input, shape index: {}]   ;;  %s402_s5 = inlined_call_operand.hbm [shape: bf16[128,128], index: 5, kind: input, shape index: {}]   ;;  %s403_s6 = inlined_call_operand.vmem [shape: f32[1,128], index: 6, kind: input, shape index: {}]   ;;  %s404_s7 = inlined_call_operand.hbm [shape: f32[1,1,128], index: 7, kind: output, shape index: {}]  }
   0x1   :  { %13 = vsyncpa [#allocation4], 0  ;;  %s308_s24 = smov [#allocation2]   ;;  %s260_s28 = scalar_lea.hbm %s402_s5, 1024 }
   0x2   :  { %s29_s25 = sshll.u32 %s308_s24, 4  ;;  %p261_p0 = scmp.ne.s32.totalorder %s402_s5, %s260_s28  ;;  %s30_s25 = int_to_ptr.vmem [resolvable:$true] %s29_s25 }
   0x3   :  { %p264_p1 = scmp.lt.u32.totalorder %s260_s28, %s402_s5 }
   0x5   :  { %p266_p2 = pnand %p264_p1, %p261_p0 }
   0x7   :  { %269 = shalt.err (!%p266_p2)
}
   0x8   :  { %s270_s10 = scalar_lea.vmem %s30_s25, 1024  ;;  %p275_p4 = scmp.lt.s32.totalorder %s30_s25, %s30_s25 }
   0x9   :  { %p271_p3 = scmp.ne.s32.totalorder %s30_s25, %s270_s10  ;;  %p276_p5 = scmp.lt.s32.totalorder %s270_s10, %s270_s10 }
   0xb   :  { %p277_p6 = por %p276_p5, %p275_p4 }
   0xd   :  { %p278_p7 = pnand %p277_p6, %p271_p3 }
   0xf   :  { %281 = shalt.err (!%p278_p7)
}
  0x10   :  { %s309_s11 = smov 64   ;;  %s310_s12 = smov 4  }
  0x11   :  { %35 = dma.hbm_to_vmem [thread:$0]  %s402_s5, 1024, %s30_s25, [#allocation3], %s309_s11, %s309_s11, %s310_s12  }
  0x12   :  { %304 = dma.done.wait [#allocation3], 1024  }
  0x13   :  { %305 = vsyncadd [#allocation3], 4294966272  ;;  %v311_v0 = vmov 0   ;;  %v312_v1 = vmov 0.0   ;;  %v44_v2 = vld [vmem:[%s399_s2] sm:$0xff]  ;;  %v251_v5 = vld [vmem:[#allocation2 + $0x8] sm:$0xff]  }
  0x14   :  { %248 = vset.pattern.permute.xlu0 %v311_v0  ;;  %221 = vmatprep.subr.bf16.mxu0 %v312_v1  ;;  %v250_v3 = vld [vmem:[#allocation2] sm:$0xff]   ;;  %v252_v6 = vld [vmem:[#allocation2 + $0x10] sm:$0xff]   ;;  %vm313_vm0 = vmmov 0   ;;  %v253_v7 = vld [vmem:[#allocation2 + $0x18] sm:$0xff]  }
  0x15   :  { %249 = vset.pattern.permute.xlu1 %v311_v0  ;;  %47 = vperm.xlu0 %248, %v44_v2   ;;  %v51_v4 = vld [vmem:[%s400_s3] sm:$0xff]  ;;  %v255_v10 = vld [vmem:[#allocation2 + $0x28] sm:$0xff]   ;;  %v256_v11 = vld [vmem:[#allocation2 + $0x30] sm:$0xff]  }
  0x16   :  { %222 = vmatpush3.bf16.msra.mxu0 %v250_v3  ;;  %237 = vmatprep.mubr.msk.bf16.mxu0 %vm313_vm0, %v312_v1  ;;  %v174_v8 = vld [vmem:[%s401_s4] sm:$0xff]  ;;  %v257_v12 = vld [vmem:[#allocation2 + $0x38] sm:$0xff]  }
  0x17   :  { %223 = vmatprep.subr.bf16.mxu0 %v312_v1  ;;  %177 = vperm.xlu1 %249, %v174_v8   ;;  %v254_v9 = vld [vmem:[#allocation2 + $0x20] sm:$0xff]  }
  0x18   :  { %v42_v14 = vld [vmem:[%s397_s0] sm:$0xff]  ;;  %s314_s0 = smov [#allocation5]  }
  0x19   :  { %54 = vperm.xlu0 %248, %v51_v4   ;;  %v43_v15 = vld [vmem:[%s398_s1] sm:$0xff]  ;;  %s194_s1 = sshll.u32 %s314_s0, 4  ;;  %s195_s1 = int_to_ptr.vmem [resolvable:$true] %s194_s1 }
  0x1a   :  { %224 = vmatpush3.bf16.msra.mxu0 %v251_v5  ;;  %v203_v21 = vld [vmem:[%s403_s6] ss:$0 sm:$0xff]  ;;  %s282_s6 = scalar_lea.vmem %s195_s1, 16  ;;  %s286_s23 = scalar_lea.vmem %s195_s1, 32 }
  0x1b   :  { %225 = vmatprep.subr.bf16.mxu0 %v312_v1  ;;  %p283_p8 = scmp.ne.s32.totalorder %s195_s1, %s282_s6  ;;  %p287_p9 = scmp.lt.s32.totalorder %s195_s1, %s195_s1 }
  0x1c   :  { %p288_p10 = scmp.lt.s32.totalorder %s286_s23, %s282_s6 }
  0x1e   :  { %226 = vmatpush3.bf16.msra.mxu0 %v252_v6  ;;  %p289_p11 = por %p288_p10, %p287_p9 }
  0x1f   :  { %227 = vmatprep.subr.bf16.mxu0 %v312_v1 }
  0x20   :  { %p290_p12 = pnand %p289_p11, %p283_p8 }
  0x22   :  { %228 = vmatpush3.bf16.msra.mxu0 %v253_v7 }
  0x23   :  { %229 = vmatprep.subr.bf16.mxu0 %v312_v1 }
  0x26   :  { %230 = vmatpush3.bf16.msra.mxu0 %v254_v9 }
  0x27   :  { %231 = vmatprep.subr.bf16.mxu0 %v312_v1 }
  0x2a   :  { %232 = vmatpush3.bf16.msra.mxu0 %v255_v10 }
  0x2b   :  { %233 = vmatprep.subr.bf16.mxu0 %v312_v1 }
  0x2e   :  { %234 = vmatpush3.bf16.msra.mxu0 %v256_v11 }
  0x2f   :  { %235 = vmatprep.subr.bf16.mxu0 %v312_v1 }
  0x32   :  { %236 = vmatpush3.bf16.msra.mxu0 %v257_v12 }
  0x94   :  { %v48_v13 = vpop.permute.xlu0 %47 }
  0x95   :  { %v50_v17 = vmul.f32 %v48_v13, %v42_v14 }
  0x96   :  { %v178_v29 = vpop.permute.xlu1 %177 }
  0x98   :  { %v55_v16 = vpop.permute.xlu0 %54 }
  0x99   :  { %v57_v18 = vmul.f32 %v55_v16, %v43_v15 }
  0x9b   :  { %v58_v19 = vadd.f32 %v57_v18, %v50_v17 }
  0x9d   :  { %v59_v20 = vpack.c.bf16 %v58_v19, %v58_v19 }
  0x9f   :  { %238 = vmatmul.mubr.bf16.vlgmr.msra.gmra.mrb[0].mxu0 %v59_v20 }
 0x172   :  { %v165_v22 = vpop.f32.mrb[0].mxu0 }
 0x173   :  { %v166_v23 = vadd.f32 %v203_v21, %v165_v22  ;;  %v239_v24 = vpop.f32.mrb[1].mxu0 }
 0x174   :  { %v168_v25 = vpop.f32.mrb[2].mxu0 }
 0x175   :  { %258 = vtanh.f32 %v166_v23  ;;  %v240_v26 = vpop.f32.mrb[3].mxu0 }
 0x17f   :  { %v259_v27 = vpop.eup %258 }
 0x180   :  { %v172_v28 = vsub.f32 %v259_v27, %v43_v15 }
 0x182   :  { %v173_v30 = vmul.f32 %v172_v28, %v172_v28 }
 0x184   :  { %v180_v31 = vmul.f32 %v178_v29, %v173_v30 }
 0x186   :  { %v181_v32 = vrot.slane %v180_v31, 4 }
 0x188   :  { %v182_v33 = vadd.f32 %v181_v32, %v180_v31 }
 0x18a   :  { %v183_v34 = vrot.slane %v182_v33, 2 }
 0x18c   :  { %v184_v35 = vadd.f32 %v183_v34, %v182_v33 }
 0x18e   :  { %v185_v36 = vrot.slane %v184_v35, 1 }
 0x190   :  { %v186_v37 = vadd.f32 %v185_v36, %v184_v35 }
 0x192   :  { %187 = vst [vmem:[#allocation5] sm:$0x1] %v186_v37 }
 0x193   :  { %293 = shalt.err (!%p290_p12)
}
 0x194   :  { %s294_s26 = scalar_lea.hbm %s404_s7, 16 }
 0x195   :  { %p295_p13 = scmp.ne.s32.totalorder %s404_s7, %s294_s26  ;;  %p298_p0 = scmp.lt.u32.totalorder %s294_s26, %s404_s7 }
 0x197   :  { %p300_p1 = pnand %p298_p0, %p295_p13 }
 0x199   :  { %303 = shalt.err (!%p300_p1)
}
 0x19a   :  { %197 = dma.vmem_to_hbm [thread:$0]  %s195_s1, 16, %s404_s7, [#allocation4]  }
 0x19b   :  { %306 = dma.done.wait [#allocation4], 16  }
 0x19c   :  { %307 = vsyncadd [#allocation4], 4294967280 }
 0x19d   :  { %201 = vsyncpa [#allocation3], 1 }
 0x19e   :  { %202 = vsyncpa [#allocation4], 1 }

</bundles_post_ra>
